<compile_context>
chip_gen: v6e
topology: v6e:2x2x1
jax: 0.10.0
libtpu: 0.0.40
codegen_flags: <defaults>
</compile_context>

<pallas_src>
import jax
import jax.numpy as jnp
from jax.experimental import pallas as pl
from jax.experimental.pallas import tpu as pltpu


def _round_up(n, m):
    return ((n + m - 1) // m) * m


def mlp_kernel(x_ref, w1_ref, b1_ref, w2_ref, b2_ref, w3_ref, b3_ref, o_ref):
    """One batch tile: three MXU matmuls fused with f32 bias-add + ReLU on the VPU."""
    w_dtype = w1_ref.dtype
    # x arrives f32 from HBM; cast to the MXU compute dtype in-kernel (no-op for f32 path).
    x = x_ref[...].astype(w_dtype)                                       # (tm, inp_p)
    h1 = jnp.dot(x, w1_ref[...], preferred_element_type=jnp.float32) + b1_ref[...]
    h1 = jnp.maximum(h1, 0.0)                                            # f32 (tm, hid_p)
    h2 = jnp.dot(h1.astype(w_dtype), w2_ref[...],
                 preferred_element_type=jnp.float32) + b2_ref[...]
    h2 = jnp.maximum(h2, 0.0)                                            # f32 (tm, hid_p)
    out = jnp.dot(h2.astype(w_dtype), w3_ref[...],
                  preferred_element_type=jnp.float32) + b3_ref[...]      # (tm, out_p) narrow
    o_ref[...] = out.astype(o_ref.dtype)


def prepare_mlp_params(params, *, use_bf16=True):
    """One-time glue: transpose PyTorch (out, in) weights to (in, out), zero-pad, cast.

    Returns (prepared_arrays, meta). Do this once and reuse across forward calls so the
    per-call path contains no weight reshaping / casting work.
    """
    w1, b1 = params["w1"], params["b1"]
    w2, b2 = params["w2"], params["b2"]
    w3, b3 = params["w3"], params["b3"]
    inp, hid, out_dim = w1.shape[1], w1.shape[0], w3.shape[0]

    compute_dtype = jnp.bfloat16 if use_bf16 else jnp.float32
    LANE = 128
    # Hidden width padded to a full lane vector (dense vregs / MXU passes); the output
    # width stays narrow (out_dim rounded to 8) so the output HBM stream carries only
    # real columns instead of a 128-lane slab. inp only needs sublane alignment.
    hid_p = _round_up(hid, LANE)
    out_p = _round_up(out_dim, 8)
    inp_p = _round_up(inp, 16 if use_bf16 else 8)

    def pad2(a, rows, cols):
        return jnp.pad(a, ((0, rows - a.shape[0]), (0, cols - a.shape[1])))

    prepared = {
        "w1t": pad2(w1.T, inp_p, hid_p).astype(compute_dtype),   # (inp_p, hid_p)
        "b1": pad2(b1.reshape(1, -1), 1, hid_p).astype(jnp.float32),
        "w2t": pad2(w2.T, hid_p, hid_p).astype(compute_dtype),   # (hid_p, hid_p)
        "b2": pad2(b2.reshape(1, -1), 1, hid_p).astype(jnp.float32),
        "w3t": pad2(w3.T, hid_p, out_p).astype(compute_dtype),   # (hid_p, out_p)
        "b3": pad2(b3.reshape(1, -1), 1, out_p).astype(jnp.float32),
    }
    meta = {"inp": inp, "hid": hid, "out_dim": out_dim,
            "inp_p": inp_p, "hid_p": hid_p, "out_p": out_p}
    return prepared, meta


def mlp_forward(x, prepared, meta, *, tm=None):
    """x: [B, inp] float32. prepared/meta from prepare_mlp_params."""
    B, inp = x.shape
    assert inp == meta["inp"], (inp, meta["inp"])
    inp_p, hid_p, out_p, out_dim = meta["inp_p"], meta["hid_p"], meta["out_p"], meta["out_dim"]
    out_dtype = x.dtype

    # Batch tile: at least 2 grid steps so ("parallel",) can shard across the 2 TCs on
    # v7x; capped at 1024 rows (amortizes per-step overhead, trivially fits VMEM).
    if tm is None:
        tm = min(1024, max(8, _round_up(-(-B // 2), 8)))
    tm = max(8, _round_up(tm, 8))
    B_p = _round_up(B, tm)                 # pad batch so any B works (sliced off below)

    # Only per-call glue: batch/feature zero-pad of x. It stays f32 (cast in-kernel).
    x_p = jnp.pad(x, ((0, B_p - B), (0, inp_p - inp)))

    grid = (B_p // tm,)

    def const(shape):                      # grid-invariant (VMEM-resident) operand
        return pl.BlockSpec(shape, lambda i: (0, 0))

    in_specs = [
        pl.BlockSpec((tm, inp_p), lambda i: (i, 0)),   # x tile (pipelined over batch)
        const((inp_p, hid_p)),                          # w1^T
        const((1, hid_p)),                              # b1
        const((hid_p, hid_p)),                          # w2^T
        const((1, hid_p)),                              # b2
        const((hid_p, out_p)),                          # w3^T (narrow)
        const((1, out_p)),                              # b3
    ]
    out_specs = pl.BlockSpec((tm, out_p), lambda i: (i, 0))

    flops = 2 * B_p * (inp_p * hid_p + hid_p * hid_p + hid_p * out_p)
    bytes_accessed = (
        B_p * inp_p * x.dtype.itemsize
        + sum(int(v.size) * v.dtype.itemsize for v in prepared.values())
        + B_p * out_p * jnp.dtype(out_dtype).itemsize
    )
    cost = pl.CostEstimate(flops=flops, transcendentals=0, bytes_accessed=bytes_accessed)

    y_pad = pl.pallas_call(
        mlp_kernel,
        out_shape=jax.ShapeDtypeStruct((B_p, out_p), out_dtype),
        grid_spec=pltpu.PrefetchScalarGridSpec(
            num_scalar_prefetch=0,
            grid=grid,
            in_specs=in_specs,
            out_specs=out_specs,
        ),
        compiler_params=pltpu.CompilerParams(
            dimension_semantics=("parallel",),
            vmem_limit_bytes=32 * 1024 * 1024,
        ),
        cost_estimate=cost,
    )(x_p, prepared["w1t"], prepared["b1"], prepared["w2t"], prepared["b2"],
      prepared["w3t"], prepared["b3"])

    return y_pad[:B, :out_dim]


def mlp_reference(x, params):
    """Pure-JAX f32 reference mirroring the PyTorch module exactly."""
    h = jnp.maximum(x @ params["w1"].T + params["b1"], 0.0)
    h = jnp.maximum(h @ params["w2"].T + params["b2"], 0.0)
    return h @ params["w3"].T + params["b3"]


def init_params(key, inp, hid=32, out_dim=2):
    """Deterministic init matching nn.Linear shapes (weight: (out, in), bias: (out,))."""
    ks = jax.random.split(key, 6)

    def linear_init(kw, kb, fan_in, fan_out):
        bound = 1.0 / jnp.sqrt(jnp.float32(fan_in))
        w = jax.random.uniform(kw, (fan_out, fan_in), jnp.float32, -bound, bound)
        b = jax.random.uniform(kb, (fan_out,), jnp.float32, -bound, bound)
        return w, b

    w1, b1 = linear_init(ks[0], ks[1], inp, hid)
    w2, b2 = linear_init(ks[2], ks[3], hid, hid)
    w3, b3 = linear_init(ks[4], ks[5], hid, out_dim)
    return {"w1": w1, "b1": b1, "w2": w2, "b2": b2, "w3": w3, "b3": b3}


if __name__ == "__main__":
    key = jax.random.PRNGKey(0)
    k_x, k_p = jax.random.split(key)

    B, inp, hid = 128, 16, 32
    x = jax.random.normal(k_x, (B, inp), jnp.float32)
    params = init_params(k_p, inp, hid=hid, out_dim=2)
    ref = mlp_reference(x, params)

    # f32 path: exact structural check against the reference.
    prep_f32, meta_f32 = prepare_mlp_params(params, use_bf16=False)
    out_f32 = jax.block_until_ready(mlp_forward(x, prep_f32, meta_f32))
    assert out_f32.shape == (B, 2), out_f32.shape
    assert jnp.allclose(out_f32, ref, atol=1e-5, rtol=1e-5), "f32 mismatch vs reference"

    # bf16 MXU path (f32 accumulation): looser tolerance, weights prepared once and reused.
    prep_bf16, meta_bf16 = prepare_mlp_params(params, use_bf16=True)
    out_bf16 = jax.block_until_ready(mlp_forward(x, prep_bf16, meta_bf16))
    assert out_bf16.shape == (B, 2), out_bf16.shape
    assert jnp.allclose(out_bf16, ref, atol=5e-2, rtol=5e-2), "bf16 mismatch vs reference"

    # Ragged batch (not a multiple of the tile) is handled by batch padding.
    out_ragged = jax.block_until_ready(mlp_forward(x[:100], prep_f32, meta_f32))
    assert out_ragged.shape == (100, 2), out_ragged.shape
    assert jnp.allclose(out_ragged, ref[:100], atol=1e-5, rtol=1e-5), "ragged-batch mismatch"

    print("KERNEL_OK")
</pallas_src>

<mosaic_0001>
module attributes {stable_mosaic.version = 11 : i64} {
  func.func @mlp_kernel(%arg0: i32, %arg1: memref<64x16xf32, #tpu.memory_space<vmem>>, %arg2: memref<16x128xf32, #tpu.memory_space<vmem>>, %arg3: memref<1x128xf32, #tpu.memory_space<vmem>>, %arg4: memref<128x128xf32, #tpu.memory_space<vmem>>, %arg5: memref<1x128xf32, #tpu.memory_space<vmem>>, %arg6: memref<128x8xf32, #tpu.memory_space<vmem>>, %arg7: memref<1x8xf32, #tpu.memory_space<vmem>>, %arg8: memref<64x8xf32, #tpu.memory_space<vmem>>) attributes {dimension_semantics = [#tpu.dimension_semantics<parallel>], iteration_bounds = array<i64: 2>, scalar_prefetch = 0 : i64, scratch_operands = 0 : i64, tpu.core_type = #tpu.core_type<tc>, window_params = [{transform_indices = @transform_0, window_bounds = array<i64: 64, 16>}, {pipeline_mode = #tpu.pipeline_mode<synchronous>, transform_indices = @transform_1, window_bounds = array<i64: 16, 128>}, {pipeline_mode = #tpu.pipeline_mode<synchronous>, transform_indices = @transform_2, window_bounds = array<i64: 1, 128>}, {pipeline_mode = #tpu.pipeline_mode<synchronous>, transform_indices = @transform_3, window_bounds = array<i64: 128, 128>}, {pipeline_mode = #tpu.pipeline_mode<synchronous>, transform_indices = @transform_4, window_bounds = array<i64: 1, 128>}, {pipeline_mode = #tpu.pipeline_mode<synchronous>, transform_indices = @transform_5, window_bounds = array<i64: 128, 8>}, {pipeline_mode = #tpu.pipeline_mode<synchronous>, transform_indices = @transform_6, window_bounds = array<i64: 1, 8>}, {transform_indices = @transform_7, window_bounds = array<i64: 64, 8>}]} {
    %c0 = arith.constant 0 : index
    %c0_0 = arith.constant 0 : index
    %0 = vector.load %arg1[%c0, %c0_0] : memref<64x16xf32, #tpu.memory_space<vmem>>, vector<64x16xf32>
    %c0_1 = arith.constant 0 : index
    %c0_2 = arith.constant 0 : index
    %1 = vector.load %arg2[%c0_1, %c0_2] : memref<16x128xf32, #tpu.memory_space<vmem>>, vector<16x128xf32>
    %cst = arith.constant dense<0.000000e+00> : vector<64x128xf32>
    %2 = tpu.matmul %0, %1, %cst {dimension_numbers = #tpu.dot_dimension_numbers<[1], [0], [0], [1], [0, 0, 1, 1], [], []>} : vector<64x16xf32>, vector<16x128xf32>, vector<64x128xf32> -> vector<64x128xf32>
    %c0_3 = arith.constant 0 : index
    %c0_4 = arith.constant 0 : index
    %3 = vector.load %arg3[%c0_3, %c0_4] : memref<1x128xf32, #tpu.memory_space<vmem>>, vector<1x128xf32>
    %4 = vector.broadcast %3 : vector<1x128xf32> to vector<64x128xf32>
    %5 = arith.addf %2, %4 : vector<64x128xf32>
    %cst_5 = arith.constant 0.000000e+00 : f32
    %6 = vector.broadcast %cst_5 : f32 to vector<64x128xf32>
    %7 = arith.maximumf %5, %6 : vector<64x128xf32>
    %c0_6 = arith.constant 0 : index
    %c0_7 = arith.constant 0 : index
    %8 = vector.load %arg4[%c0_6, %c0_7] : memref<128x128xf32, #tpu.memory_space<vmem>>, vector<128x128xf32>
    %cst_8 = arith.constant dense<0.000000e+00> : vector<64x128xf32>
    %9 = tpu.matmul %7, %8, %cst_8 {dimension_numbers = #tpu.dot_dimension_numbers<[1], [0], [0], [1], [0, 0, 1, 1], [], []>} : vector<64x128xf32>, vector<128x128xf32>, vector<64x128xf32> -> vector<64x128xf32>
    %c0_9 = arith.constant 0 : index
    %c0_10 = arith.constant 0 : index
    %10 = vector.load %arg5[%c0_9, %c0_10] : memref<1x128xf32, #tpu.memory_space<vmem>>, vector<1x128xf32>
    %11 = vector.broadcast %10 : vector<1x128xf32> to vector<64x128xf32>
    %12 = arith.addf %9, %11 : vector<64x128xf32>
    %cst_11 = arith.constant 0.000000e+00 : f32
    %13 = vector.broadcast %cst_11 : f32 to vector<64x128xf32>
    %14 = arith.maximumf %12, %13 : vector<64x128xf32>
    %c0_12 = arith.constant 0 : index
    %c0_13 = arith.constant 0 : index
    %15 = vector.load %arg6[%c0_12, %c0_13] : memref<128x8xf32, #tpu.memory_space<vmem>>, vector<128x8xf32>
    %cst_14 = arith.constant dense<0.000000e+00> : vector<64x8xf32>
    %16 = tpu.matmul %14, %15, %cst_14 {dimension_numbers = #tpu.dot_dimension_numbers<[1], [0], [0], [1], [0, 0, 1, 1], [], []>} : vector<64x128xf32>, vector<128x8xf32>, vector<64x8xf32> -> vector<64x8xf32>
    %c0_15 = arith.constant 0 : index
    %c0_16 = arith.constant 0 : index
    %17 = vector.load %arg7[%c0_15, %c0_16] : memref<1x8xf32, #tpu.memory_space<vmem>>, vector<1x8xf32>
    %18 = vector.broadcast %17 : vector<1x8xf32> to vector<64x8xf32>
    %19 = arith.addf %16, %18 : vector<64x8xf32>
    %c0_17 = arith.constant 0 : index
    %c0_18 = arith.constant 0 : index
    %20 = vector.load %arg8[%c0_17, %c0_18] : memref<64x8xf32, #tpu.memory_space<vmem>>, vector<64x8xf32>
    tpu.vector_store %arg8[%c0_17, %c0_18], %19 {strides = array<i32>} : memref<64x8xf32, #tpu.memory_space<vmem>>, vector<64x8xf32>,
    return
  }
  func.func @transform_0(%arg0: i32) -> (i32, i32) {
    %c0_i32 = arith.constant 0 : i32
    %c0_i32_0 = arith.constant 0 : i32
    return %arg0, %c0_i32 : i32, i32
  }
  func.func @transform_1(%arg0: i32) -> (i32, i32) {
    %c0_i32 = arith.constant 0 : i32
    %c0_i32_0 = arith.constant 0 : i32
    %c0_i32_1 = arith.constant 0 : i32
    return %c0_i32, %c0_i32_0 : i32, i32
  }
  func.func @transform_2(%arg0: i32) -> (i32, i32) {
    %c0_i32 = arith.constant 0 : i32
    %c0_i32_0 = arith.constant 0 : i32
    %c0_i32_1 = arith.constant 0 : i32
    return %c0_i32, %c0_i32_0 : i32, i32
  }
  func.func @transform_3(%arg0: i32) -> (i32, i32) {
    %c0_i32 = arith.constant 0 : i32
    %c0_i32_0 = arith.constant 0 : i32
    %c0_i32_1 = arith.constant 0 : i32
    return %c0_i32, %c0_i32_0 : i32, i32
  }
  func.func @transform_4(%arg0: i32) -> (i32, i32) {
    %c0_i32 = arith.constant 0 : i32
    %c0_i32_0 = arith.constant 0 : i32
    %c0_i32_1 = arith.constant 0 : i32
    return %c0_i32, %c0_i32_0 : i32, i32
  }
  func.func @transform_5(%arg0: i32) -> (i32, i32) {
    %c0_i32 = arith.constant 0 : i32
    %c0_i32_0 = arith.constant 0 : i32
    %c0_i32_1 = arith.constant 0 : i32
    return %c0_i32, %c0_i32_0 : i32, i32
  }
  func.func @transform_6(%arg0: i32) -> (i32, i32) {
    %c0_i32 = arith.constant 0 : i32
    %c0_i32_0 = arith.constant 0 : i32
    %c0_i32_1 = arith.constant 0 : i32
    return %c0_i32, %c0_i32_0 : i32, i32
  }
  func.func @transform_7(%arg0: i32) -> (i32, i32) {
    %c0_i32 = arith.constant 0 : i32
    %c0_i32_0 = arith.constant 0 : i32
    return %arg0, %c0_i32 : i32, i32
  }
}

</mosaic_0001>

<bundles_post_ra>
// kernel: tpu_custom_call.1
= control target key start
LH: loop header
LB: loop body
LE: loop exit
PB: predicated region body
PF: predicated region fallthrough
CT: control target
= control target key end

     0   :  { %s1006_s24 = smov 0   ;;  %s1167_s0 = inlined_call_operand.vmem [shape: f32[128,16], index: 0, kind: input, shape index: {}]   ;;  %s1168_s1 = inlined_call_operand.vmem [shape: f32[16,128], index: 1, kind: input, shape index: {}]   ;;  %s1169_s2 = inlined_call_operand.vmem [shape: f32[1,128], index: 2, kind: input, shape index: {}]   ;;  %s1170_s3 = inlined_call_operand.vmem [shape: f32[128,128], index: 3, kind: input, shape index: {}]   ;;  %s1171_s4 = inlined_call_operand.vmem [shape: f32[1,128], index: 4, kind: input, shape index: {}]   ;;  %s1172_s5 = inlined_call_operand.vmem [shape: f32[128,8], index: 5, kind: input, shape index: {}]   ;;  %s1173_s6 = inlined_call_operand.vmem [shape: f32[1,8], index: 6, kind: input, shape index: {}]   ;;  %s1174_s7 = inlined_call_operand.vmem [shape: f32[128,8], index: 7, kind: output, shape index: {}]  }
   0x1 LB: > { %s766_s25 = sadd.s32 4294967295, %s964_s24   ;;  %p770_p0 = scmp.ge.s32.totalorder %s964_s24, 1  ;;  %s964_s24 = sphi %s1006_s24, %s17_s24  }
   0x2   : > { %p238_p1 = scmp.lt.s32.totalorder %s964_s24, 3 }
   0x4   : > { %p239_p2 = pnand %p770_p0, %p238_p1 }
   0x5   : > { %s771_s30 = sshll.u32 (!%p239_p2), %s766_s25, 3 }
   0x6   : > { %242 = sbr.rel (%p239_p2) target bundleno = 627 (0x273), region = 48  ;;  %p271_p3 = scmp.lt.s32.totalorder (!%p239_p2), %s771_s30, 15 }
   0xb   : > { %v291_v0 = vld [vmem:[%s1168_s1 + $0x8] sm:$0xff]  ;;  %v290_v1 = vld [vmem:[%s1168_s1] sm:$0xff]  ;;  %v452_v2 = vld [vmem:[%s1170_s3 + $0x78] sm:$0xff]  ;;  %s1176_s30 = smov (!%p271_p3, %s771_s30), 15  ;;  %vm299_vm0 = vcmask 130048   ;;  %vm701_vm1 = vcmask 64512  }
   0xc   : > { %846 = vmatprep.subr.mxu0 %v291_v0  ;;  %862 = vmatprep.subr.mxu1 %v452_v2  ;;  %v451_v3 = vld [vmem:[%s1170_s3 + $0x70] sm:$0xff]  ;;  %v450_v4 = vld [vmem:[%s1170_s3 + $0x68] sm:$0xff]  ;;  %v449_v5 = vld [vmem:[%s1170_s3 + $0x60] sm:$0xff]  ;;  %s772_s16 = sshll.u32 %s1176_s30, 3 }
   0xd   : > { %847 = vmatpush3.msra.mxu0 %v291_v0  ;;  %863 = vmatpush3.msra.mxu1 %v452_v2  ;;  %s1040_s19 = scalar_lea.vmem %s1167_s0, %s772_s16  ;;  %v448_v6 = vld [vmem:[%s1170_s3 + $0x58] sm:$0xff]  ;;  %v447_v10 = vld [vmem:[%s1170_s3 + $0x50] sm:$0xff]  ;;  %v446_v12 = vld [vmem:[%s1170_s3 + $0x48] sm:$0xff]  ;;  %s280_s25 = scalar_lea.vmem %s1174_s7, %s772_s16 }
   0xe   : > { %848 = vmatprep.subr.mxu0 %v290_v1  ;;  %864 = vmatprep.subr.mxu1 %v451_v3  ;;  %v282_v7 = vld [vmem:[%s1040_s19] sm:$0xff]  ;;  %v283_v8 = vld [vmem:[%s1040_s19 + $0x8] sm:$0xff]  ;;  %v284_v9 = vld [vmem:[%s1040_s19 + $0x10] sm:$0xff] }
   0xf   : > { %849 = vmatpush3.msra.mxu0 %v290_v1  ;;  %865 = vmatpush3.msra.mxu1 %v451_v3  ;;  %v285_v11 = vld [vmem:[%s1040_s19 + $0x18] sm:$0xff]  ;;  %v286_v13 = vld [vmem:[%s1040_s19 + $0x20] sm:$0xff]  ;;  %v287_v15 = vld [vmem:[%s1040_s19 + $0x28] sm:$0xff] }
  0x10   : > { %866 = vmatprep.subr.mxu1 %v450_v4  ;;  %850 = vmatprep.mubr.msk.f32.mxu0 %vm299_vm0, %v282_v7  ;;  %v445_v14 = vld [vmem:[%s1170_s3 + $0x40] sm:$0xff]  ;;  %v444_v16 = vld [vmem:[%s1170_s3 + $0x38] sm:$0xff]  ;;  %v288_v17 = vld [vmem:[%s1040_s19 + $0x30] sm:$0xff] }
  0x11   : > { %867 = vmatpush3.msra.mxu1 %v450_v4  ;;  %851 = vmatmul.mubr.msk.f32.vlgmr.msra.gmra.mxu0 %vm299_vm0, %v283_v8  ;;  %v443_v18 = vld [vmem:[%s1170_s3 + $0x30] sm:$0xff]  ;;  %v289_v19 = vld [vmem:[%s1040_s19 + $0x38] sm:$0xff]  ;;  %v442_v20 = vld [vmem:[%s1170_s3 + $0x28] sm:$0xff] }
  0x12   : > { %868 = vmatprep.subr.mxu1 %v449_v5  ;;  %853 = vmatprep.mubr.msk.f32.mxu0 %vm299_vm0, %v284_v9  ;;  %v441_v21 = vld [vmem:[%s1170_s3 + $0x20] sm:$0xff]  ;;  %v440_v22 = vld [vmem:[%s1170_s3 + $0x18] sm:$0xff]  ;;  %v439_v23 = vld [vmem:[%s1170_s3 + $0x10] sm:$0xff] }
  0x13   : > { %869 = vmatpush3.msra.mxu1 %v449_v5  ;;  %v438_v24 = vld [vmem:[%s1170_s3 + $0x8] sm:$0xff]  ;;  %v437_v25 = vld [vmem:[%s1170_s3] sm:$0xff]  ;;  %v588_v26 = vld [vmem:[%s1172_s5 + $0x78] sm:$0xff] }
  0x14   : > { %870 = vmatprep.subr.mxu1 %v448_v6  ;;  %v587_v27 = vld [vmem:[%s1172_s5 + $0x70] sm:$0xff]  ;;  %906 = vmatprep.subr.mxu0 %v588_v26  ;;  %v586_v28 = vld [vmem:[%s1172_s5 + $0x68] sm:$0xff]  ;;  %v585_v29 = vld [vmem:[%s1172_s5 + $0x60] sm:$0xff] }
  0x15   : > { %871 = vmatpush3.msra.mxu1 %v448_v6  ;;  %854 = vmatmul.mubr.msk.f32.gmra.mxu0 %vm299_vm0, %v285_v11  ;;  %v584_v30 = vld [vmem:[%s1172_s5 + $0x58] sm:$0xff]  ;;  %v583_v31 = vld [vmem:[%s1172_s5 + $0x50] sm:$0xff]  ;;  %v582_v32 = vld [vmem:[%s1172_s5 + $0x48] sm:$0xff] }
  0x16   : > { %872 = vmatprep.subr.mxu1 %v447_v10  ;;  %856 = vmatprep.mubr.msk.f32.mxu0 %vm299_vm0, %v286_v13  ;;  %v581_v33 = vld [vmem:[%s1172_s5 + $0x40] sm:$0xff]  ;;  %v580_v34 = vld [vmem:[%s1172_s5 + $0x38] sm:$0xff]  ;;  %v579_v35 = vld [vmem:[%s1172_s5 + $0x30] sm:$0xff] }
  0x17   : > { %873 = vmatpush3.msra.mxu1 %v447_v10  ;;  %907 = vmatpush3.msra.mxu0 %v588_v26  ;;  %v578_v36 = vld [vmem:[%s1172_s5 + $0x28] sm:$0xff]  ;;  %v577_v37 = vld [vmem:[%s1172_s5 + $0x20] sm:$0xff]  ;;  %v576_v63 = vld [vmem:[%s1172_s5 + $0x18] sm:$0xff] }
  0x18   : > { %874 = vmatprep.subr.mxu1 %v446_v12  ;;  %908 = vmatprep.subr.mxu0 %v587_v27  ;;  %v775_v38 = vld [vmem:[%s1169_s2] ss:$0 sm:$0xff]  ;;  %v575_v0 = vld [vmem:[%s1172_s5 + $0x10] sm:$0xff]  ;;  %v574_v1 = vld [vmem:[%s1172_s5 + $0x8] sm:$0xff] }
  0x19   : > { %875 = vmatpush3.msra.mxu1 %v446_v12  ;;  %857 = vmatmul.mubr.msk.f32.gmra.mxu0 %vm299_vm0, %v287_v15  ;;  %v573_v2 = vld [vmem:[%s1172_s5] sm:$0xff] }
  0x1a   : > { %876 = vmatprep.subr.mxu1 %v445_v14  ;;  %859 = vmatprep.mubr.msk.f32.mxu0 %vm299_vm0, %v288_v17  ;;  %v784_v3 = vld [vmem:[%s1171_s4] ss:$0 sm:$0xff] }
  0x1b   : > { %877 = vmatpush3.msra.mxu1 %v445_v14  ;;  %909 = vmatpush3.msra.mxu0 %v587_v27 }
  0x1c   : > { %878 = vmatprep.subr.mxu1 %v444_v16  ;;  %910 = vmatprep.subr.mxu0 %v586_v28 }
  0x1d   : > { %879 = vmatpush3.msra.mxu1 %v444_v16  ;;  %860 = vmatmul.mubr.msk.f32.gmra.mxu0 %vm299_vm0, %v289_v19 }
  0x1e   : > { %880 = vmatprep.subr.mxu1 %v443_v18  ;;  %911 = vmatpush3.msra.mxu0 %v586_v28  ;;  %v785_v28 = vld [vmem:[%s1173_s6] ss:$0 sm:$0xff] }
  0x1f   : > { %881 = vmatpush3.msra.mxu1 %v443_v18  ;;  %912 = vmatprep.subr.mxu0 %v585_v29 }
  0x20   : > { %882 = vmatprep.subr.mxu1 %v442_v20  ;;  %913 = vmatpush3.msra.mxu0 %v585_v29 }
  0x21   : > { %883 = vmatpush3.msra.mxu1 %v442_v20  ;;  %914 = vmatprep.subr.mxu0 %v584_v30 }
  0x22   : > { %884 = vmatprep.subr.mxu1 %v441_v21  ;;  %915 = vmatpush3.msra.mxu0 %v584_v30 }
  0x23   : > { %885 = vmatpush3.msra.mxu1 %v441_v21  ;;  %916 = vmatprep.subr.mxu0 %v583_v31 }
  0x24   : > { %886 = vmatprep.subr.mxu1 %v440_v22  ;;  %917 = vmatpush3.msra.mxu0 %v583_v31 }
  0x25   : > { %887 = vmatpush3.msra.mxu1 %v440_v22  ;;  %918 = vmatprep.subr.mxu0 %v582_v32 }
  0x26   : > { %888 = vmatprep.subr.mxu1 %v439_v23  ;;  %919 = vmatpush3.msra.mxu0 %v582_v32 }
  0x27   : > { %889 = vmatpush3.msra.mxu1 %v439_v23  ;;  %920 = vmatprep.subr.mxu0 %v581_v33 }
  0x28   : > { %890 = vmatprep.subr.mxu1 %v438_v24  ;;  %921 = vmatpush3.msra.mxu0 %v581_v33 }
  0x29   : > { %891 = vmatpush3.msra.mxu1 %v438_v24  ;;  %922 = vmatprep.subr.mxu0 %v580_v34 }
  0x2a   : > { %892 = vmatprep.subr.mxu1 %v437_v25  ;;  %923 = vmatpush3.msra.mxu0 %v580_v34 }
  0x2b   : > { %893 = vmatpush3.msra.mxu1 %v437_v25  ;;  %924 = vmatprep.subr.mxu0 %v579_v35 }
  0x2c   : > { %925 = vmatpush3.msra.mxu0 %v579_v35 }
  0x2d   : > { %926 = vmatprep.subr.mxu0 %v578_v36 }
  0x2e   : > { %927 = vmatpush3.msra.mxu0 %v578_v36 }
  0x2f   : > { %928 = vmatprep.subr.mxu0 %v577_v37 }
  0x30   : > { %929 = vmatpush3.msra.mxu0 %v577_v37 }
  0x31   : > { %930 = vmatprep.subr.mxu0 %v576_v63 }
  0x32   : > { %931 = vmatpush3.msra.mxu0 %v576_v63 }
  0x33   : > { %932 = vmatprep.subr.mxu0 %v575_v0 }
  0x34   : > { %933 = vmatpush3.msra.mxu0 %v575_v0 }
  0x35   : > { %934 = vmatprep.subr.mxu0 %v574_v1 }
  0x36   : > { %935 = vmatpush3.msra.mxu0 %v574_v1 }
  0x37   : > { %936 = vmatprep.subr.mxu0 %v573_v2 }
  0x38   : > { %937 = vmatpush3.msra.mxu0 %v573_v2 }
  0xd1   : > { %v852_v39 = vpop.f32.mrf.mxu0 }
  0xd2   : > { %v396_v40 = vadd.f32 %v852_v39, %v775_v38 }
  0xd3   : > { %v390_v41 = vpop.f32.mrf.mxu0 }
  0xd4   : > { %v391_v42 = vadd.f32 %v775_v38, %v390_v41  ;;  %v430_v45 = vmax.f32 %v396_v40, 0.0 }
  0xd5   : > { %v855_v43 = vpop.f32.mrf.mxu0 }
  0xd6   : > { %v429_v44 = vmax.f32 %v391_v42, 0.0  ;;  %v406_v46 = vadd.f32 %v855_v43, %v775_v38 }
  0xd7   : > { %v400_v47 = vpop.f32.mrf.mxu0 }
  0xd8   : > { %v401_v48 = vadd.f32 %v775_v38, %v400_v47  ;;  %894 = vmatprep.mubr.f32.mxu1 %v429_v44  ;;  %v432_v51 = vmax.f32 %v406_v46, 0.0 }
  0xd9   : > { %v858_v49 = vpop.f32.mrf.mxu0  ;;  %895 = vmatmul.mubr.f32.vlgmr.msra.gmra.mxu1 %v430_v45 }
  0xda   : > { %v431_v50 = vmax.f32 %v401_v48, 0.0  ;;  %v416_v52 = vadd.f32 %v858_v49, %v775_v38 }
  0xdb   : > { %v410_v53 = vpop.f32.mrf.mxu0 }
  0xdc   : > { %v411_v54 = vadd.f32 %v775_v38, %v410_v53  ;;  %897 = vmatprep.mubr.f32.mxu1 %v431_v50  ;;  %v434_v57 = vmax.f32 %v416_v52, 0.0 }
  0xdd   : > { %v861_v55 = vpop.f32.mrf.mxu0  ;;  %898 = vmatmul.mubr.f32.gmra.mxu1 %v432_v51 }
  0xde   : > { %v433_v56 = vmax.f32 %v411_v54, 0.0  ;;  %v426_v58 = vadd.f32 %v861_v55, %v775_v38 }
  0xdf   : > { %v420_v59 = vpop.f32.mrf.mxu0 }
  0xe0   : > { %v421_v60 = vadd.f32 %v775_v38, %v420_v59  ;;  %900 = vmatprep.mubr.f32.mxu1 %v433_v56  ;;  %v436_v62 = vmax.f32 %v426_v58, 0.0 }
  0xe1   : > { %901 = vmatmul.mubr.f32.gmra.mxu1 %v434_v57 }
  0xe2   : > { %v435_v61 = vmax.f32 %v421_v60, 0.0 }
  0xe4   : > { %903 = vmatprep.mubr.f32.mxu1 %v435_v61 }
  0xe5   : > { %904 = vmatmul.mubr.f32.gmra.mxu1 %v436_v62 }
 0x199   : > { %v896_v4 = vpop.f32.mrf.mxu1 }
 0x19a   : > { %v532_v5 = vadd.f32 %v896_v4, %v784_v3 }
 0x19b   : > { %v526_v6 = vpop.f32.mrf.mxu1 }
 0x19c   : > { %v527_v7 = vadd.f32 %v784_v3, %v526_v6  ;;  %v566_v10 = vmax.f32 %v532_v5, 0.0 }
 0x19d   : > { %v899_v8 = vpop.f32.mrf.mxu1 }
 0x19e   : > { %v565_v9 = vmax.f32 %v527_v7, 0.0  ;;  %v542_v11 = vadd.f32 %v899_v8, %v784_v3 }
 0x19f   : > { %v536_v12 = vpop.f32.mrf.mxu1 }
 0x1a0   : > { %v537_v13 = vadd.f32 %v784_v3, %v536_v12  ;;  %938 = vmatprep.mubr.f32.mxu0 %v565_v9  ;;  %v568_v16 = vmax.f32 %v542_v11, 0.0 }
 0x1a1   : > { %v902_v14 = vpop.f32.mrf.mxu1  ;;  %939 = vmatmul.mubr.f32.vlgmr.msra.gmra.mxu0 %v566_v10 }
 0x1a2   : > { %v567_v15 = vmax.f32 %v537_v13, 0.0  ;;  %v552_v17 = vadd.f32 %v902_v14, %v784_v3 }
 0x1a3   : > { %v546_v18 = vpop.f32.mrf.mxu1 }
 0x1a4   : > { %v547_v19 = vadd.f32 %v784_v3, %v546_v18  ;;  %941 = vmatprep.mubr.f32.mxu0 %v567_v15  ;;  %v570_v22 = vmax.f32 %v552_v17, 0.0 }
 0x1a5   : > { %v905_v20 = vpop.f32.mrf.mxu1  ;;  %942 = vmatmul.mubr.f32.gmra.mxu0 %v568_v16 }
 0x1a6   : > { %v569_v21 = vmax.f32 %v547_v19, 0.0  ;;  %v562_v23 = vadd.f32 %v905_v20, %v784_v3 }
 0x1a7   : > { %v556_v24 = vpop.f32.mrf.mxu1 }
 0x1a8   : > { %v557_v25 = vadd.f32 %v784_v3, %v556_v24  ;;  %944 = vmatprep.mubr.f32.mxu0 %v569_v21  ;;  %v572_v27 = vmax.f32 %v562_v23, 0.0 }
 0x1a9   : > { %945 = vmatmul.mubr.f32.gmra.mxu0 %v570_v22 }
 0x1aa   : > { %v571_v26 = vmax.f32 %v557_v25, 0.0 }
 0x1ac   : > { %947 = vmatprep.mubr.f32.mxu0 %v571_v26 }
 0x1ad   : > { %948 = vmatmul.mubr.f32.gmra.mxu0 %v572_v27 }
 0x261   : > { %v940_v29 = vpop.f32.mrf.mxu0 }
 0x262   : > { %v668_v30 = vadd.f32 %v940_v29, %v785_v28 }
 0x263   : > { %v662_v31 = vpop.f32.mrf.mxu0 }
 0x264   : > { %703 = vst.msk [vmem:[%s280_s25 + $0x8] sm:$0xff] %vm701_vm1, %v668_v30  ;;  %v663_v32 = vadd.f32 %v785_v28, %v662_v31 }
 0x265   : > { %v943_v33 = vpop.f32.mrf.mxu0 }
 0x266   : > { %702 = vst.msk [vmem:[%s280_s25] sm:$0xff] %vm701_vm1, %v663_v32  ;;  %v678_v34 = vadd.f32 %v943_v33, %v785_v28 }
 0x267   : > { %v672_v35 = vpop.f32.mrf.mxu0 }
 0x268   : > { %705 = vst.msk [vmem:[%s280_s25 + $0x18] sm:$0xff] %vm701_vm1, %v678_v34  ;;  %v673_v36 = vadd.f32 %v785_v28, %v672_v35 }
 0x269   : > { %v946_v37 = vpop.f32.mrf.mxu0 }
 0x26a   : > { %704 = vst.msk [vmem:[%s280_s25 + $0x10] sm:$0xff] %vm701_vm1, %v673_v36  ;;  %v688_v38 = vadd.f32 %v946_v37, %v785_v28 }
 0x26b   : > { %v682_v39 = vpop.f32.mrf.mxu0 }
 0x26c   : > { %707 = vst.msk [vmem:[%s280_s25 + $0x28] sm:$0xff] %vm701_vm1, %v688_v38  ;;  %v683_v40 = vadd.f32 %v785_v28, %v682_v39 }
 0x26d   : > { %v949_v41 = vpop.f32.mrf.mxu0 }
 0x26e   : > { %706 = vst.msk [vmem:[%s280_s25 + $0x20] sm:$0xff] %vm701_vm1, %v683_v40  ;;  %v698_v42 = vadd.f32 %v949_v41, %v785_v28 }
 0x26f   : > { %v692_v43 = vpop.f32.mrf.mxu0 }
 0x270   : > { %709 = vst.msk [vmem:[%s280_s25 + $0x38] sm:$0xff] %vm701_vm1, %v698_v42  ;;  %v693_v44 = vadd.f32 %v785_v28, %v692_v43 }
 0x272   : > { %708 = vst.msk [vmem:[%s280_s25 + $0x30] sm:$0xff] %vm701_vm1, %v693_v44 }
 0x273 PF: > { %s17_s24 = sadd.s32 1, %s964_s24  }
 0x274   : > { %p14_p4 = scmp.ge.s32.totalorder %s17_s24, 4  }
 0x276   :  { %16 = sbr.rel (!%p14_p4) target bundleno = 1 (0x1), region = 78 }

</bundles_post_ra>
